<compile_context>
chip_gen: v6e
topology: v6e:2x2x1
jax: 0.10.0
libtpu: 0.0.40
codegen_flags: <defaults>
</compile_context>

<pallas_src>
import functools

import jax
import jax.numpy as jnp
from jax import lax
from jax.experimental import pallas as pl
from jax.experimental.pallas import tpu as pltpu


def _encoder_kernel(src_ref,      # (T*B, E)  flattened seq-major input
                    wih_f_ref,    # (E, H)
                    wih_b_ref,    # (E, H)
                    b_f_ref,      # (1, H)   b_ih + b_hh, fwd
                    b_b_ref,      # (1, H)   b_ih + b_hh, bwd
                    whh_f_ref,    # (H, H)
                    whh_b_ref,    # (H, H)
                    fcw_f_ref,    # (H, D)   fc weight rows for fwd half
                    fcw_b_ref,    # (H, D)   fc weight rows for bwd half
                    fcb_ref,      # (1, D)
                    out_ref,      # (T*B, 2H) outputs [fwd | bwd]
                    hid_ref,      # (B, D)    final projected hidden
                    xf_s,         # (T*B, H) scratch: fwd input-proj, reused as fwd outputs
                    xb_s,         # (T*B, H) scratch: bwd input-proj, reused as bwd outputs
                    hf_s,         # (B, H)   scratch: fwd hidden state
                    hb_s,         # (B, H)   scratch: bwd hidden state
                    *, seq_len, batch):
    T, B = seq_len, batch

    # ---- Hoisted input projections: two large MXU-shaped matmuls ----------
    x = src_ref[...]                                            # (T*B, E)
    xf_s[...] = (jnp.dot(x, wih_f_ref[...], preferred_element_type=jnp.float32)
                 + b_f_ref[...])
    xb_s[...] = (jnp.dot(x, wih_b_ref[...], preferred_element_type=jnp.float32)
                 + b_b_ref[...])

    hf_s[...] = jnp.zeros_like(hf_s)
    hb_s[...] = jnp.zeros_like(hb_s)

    # ---- Interleaved fwd/bwd recurrence (serial over T, fully unrolled) ---
    def step(t, carry):
        rf = pl.multiple_of(t * B, B)                # row offset, fwd (time t)
        rb = pl.multiple_of((T - 1 - t) * B, B)      # row offset, bwd (time T-1-t)

        hf = jnp.tanh(
            xf_s[pl.ds(rf, B), :]
            + jnp.dot(hf_s[...], whh_f_ref[...],
                      preferred_element_type=jnp.float32))
        hb = jnp.tanh(
            xb_s[pl.ds(rb, B), :]
            + jnp.dot(hb_s[...], whh_b_ref[...],
                      preferred_element_type=jnp.float32))

        hf_s[...] = hf
        hb_s[...] = hb
        # Reuse the projection buffers as the per-direction output buffers.
        xf_s[pl.ds(rf, B), :] = hf
        xb_s[pl.ds(rb, B), :] = hb
        return carry

    lax.fori_loop(0, T, step, 0, unroll=True)

    # ---- Single lane-dense output store: (T*B, 2H) = [fwd | bwd] ----------
    out_ref[...] = jnp.concatenate(
        [xf_s[...], xb_s[...]], axis=-1).astype(out_ref.dtype)

    # ---- hidden = tanh(fc(concat(h_fwd_T, h_bwd_T))) as two matmuls -------
    hid_ref[...] = jnp.tanh(
        jnp.dot(hf_s[...], fcw_f_ref[...], preferred_element_type=jnp.float32)
        + jnp.dot(hb_s[...], fcw_b_ref[...], preferred_element_type=jnp.float32)
        + fcb_ref[...]).astype(hid_ref.dtype)


@jax.jit
def encoder_forward(src, params):
    """src: (T, B, E) float32.  Returns (outputs (T, B, 2H), hidden (B, D))."""
    T, B, E = src.shape
    H = params['whh_f'].shape[0]
    D = params['fcb'].shape[-1]

    src2d = src.reshape(T * B, E)        # contiguous -> free metadata reshape
    fcw_f = params['fcw'][:H]            # (H, D)
    fcw_b = params['fcw'][H:]            # (H, D)

    vmem = pl.BlockSpec(memory_space=pltpu.MemorySpace.VMEM)
    kernel = functools.partial(_encoder_kernel, seq_len=T, batch=B)

    # TODO(synk): for long sequences, block the T axis with a grid (hidden
    # state kept resident in scratch, src/outputs streamed per block) so VMEM
    # stays within v7x's 64 MiB; at these sizes whole-array residency is best.
    out2d, hidden = pl.pallas_call(
        kernel,
        out_shape=(
            jax.ShapeDtypeStruct((T * B, 2 * H), jnp.float32),
            jax.ShapeDtypeStruct((B, D), jnp.float32),
        ),
        in_specs=[vmem] * 10,
        out_specs=(vmem, vmem),
        scratch_shapes=[
            pltpu.VMEM((T * B, H), jnp.float32),   # xf (proj -> fwd outputs)
            pltpu.VMEM((T * B, H), jnp.float32),   # xb (proj -> bwd outputs)
            pltpu.VMEM((B, H), jnp.float32),       # hf state
            pltpu.VMEM((B, H), jnp.float32),       # hb state
        ],
    )(src2d,
      params['wih_f'], params['wih_b'],
      params['b_f'], params['b_b'],
      params['whh_f'], params['whh_b'],
      fcw_f, fcw_b, params['fcb'])

    return out2d.reshape(T, B, 2 * H), hidden


def init_params(key, emb_dim, enc_hid_dim, dec_hid_dim):
    """Deterministic synthetic parameters (shapes match nn.RNN / nn.Linear)."""
    ks = jax.random.split(key, 10)
    scale = 1.0 / jnp.sqrt(enc_hid_dim)

    def u(k, shape):
        return jax.random.uniform(k, shape, jnp.float32, -scale, scale)

    # nn.RNN stores weight_ih_l0: (H, E), weight_hh_l0: (H, H); kept
    # pre-transposed for (rows, in) @ (in, out) matmuls in the kernel.
    wih_f = u(ks[0], (emb_dim, enc_hid_dim))
    whh_f = u(ks[1], (enc_hid_dim, enc_hid_dim))
    b_f = u(ks[2], (1, enc_hid_dim)) + u(ks[3], (1, enc_hid_dim))  # b_ih + b_hh
    wih_b = u(ks[4], (emb_dim, enc_hid_dim))
    whh_b = u(ks[5], (enc_hid_dim, enc_hid_dim))
    b_b = u(ks[6], (1, enc_hid_dim)) + u(ks[7], (1, enc_hid_dim))
    # nn.Linear(2H, D): weight (D, 2H) -> transposed (2H, D)
    fcw = u(ks[8], (2 * enc_hid_dim, dec_hid_dim))
    fcb = u(ks[9], (1, dec_hid_dim))
    return dict(wih_f=wih_f, whh_f=whh_f, b_f=b_f,
                wih_b=wih_b, whh_b=whh_b, b_b=b_b,
                fcw=fcw, fcb=fcb)


def reference_forward(src, params):
    """Pure-JAX reference of the bidirectional tanh-RNN encoder."""
    T, B, E = src.shape
    H = params['whh_f'].shape[0]

    def fwd_step(h, x):
        h = jnp.tanh(x @ params['wih_f'] + h @ params['whh_f'] + params['b_f'][0])
        return h, h

    def bwd_step(h, x):
        h = jnp.tanh(x @ params['wih_b'] + h @ params['whh_b'] + params['b_b'][0])
        return h, h

    h0 = jnp.zeros((B, H), jnp.float32)
    hf_final, out_f = lax.scan(fwd_step, h0, src)
    hb_final, out_b_rev = lax.scan(bwd_step, h0, src[::-1])
    out_b = out_b_rev[::-1]
    outputs = jnp.concatenate([out_f, out_b], axis=-1)
    hcat = jnp.concatenate([hf_final, hb_final], axis=1)
    hidden = jnp.tanh(hcat @ params['fcw'] + params['fcb'][0])
    return outputs, hidden


if __name__ == "__main__":
    # Small shapes: src_len=8, batch=2, emb_dim=32, enc_hid=32, dec_hid=32.
    T, B, E, H, D = 8, 2, 32, 32, 32

    key = jax.random.PRNGKey(0)
    k_src, k_par = jax.random.split(key)
    src = jax.random.normal(k_src, (T, B, E), jnp.float32)
    params = init_params(k_par, E, H, D)

    # NOTE: dropout is identity in inference mode (no masking applied).
    outputs, hidden = encoder_forward(src, params)
    outputs = jax.block_until_ready(outputs)
    hidden = jax.block_until_ready(hidden)

    assert outputs.shape == (T, B, 2 * H), outputs.shape
    assert hidden.shape == (B, D), hidden.shape

    ref_out, ref_hid = reference_forward(src, params)
    assert jnp.allclose(outputs, ref_out, atol=1e-5, rtol=1e-5)
    assert jnp.allclose(hidden, ref_hid, atol=1e-5, rtol=1e-5)

    print("KERNEL_OK")
</pallas_src>

<mosaic_0001>
module attributes {stable_mosaic.version = 11 : i64} {
  func.func @_encoder_kernel(%arg0: memref<16x32xf32, #tpu.memory_space<vmem>>, %arg1: memref<32x32xf32, #tpu.memory_space<vmem>>, %arg2: memref<32x32xf32, #tpu.memory_space<vmem>>, %arg3: memref<1x32xf32, #tpu.memory_space<vmem>>, %arg4: memref<1x32xf32, #tpu.memory_space<vmem>>, %arg5: memref<32x32xf32, #tpu.memory_space<vmem>>, %arg6: memref<32x32xf32, #tpu.memory_space<vmem>>, %arg7: memref<32x32xf32, #tpu.memory_space<vmem>>, %arg8: memref<32x32xf32, #tpu.memory_space<vmem>>, %arg9: memref<1x32xf32, #tpu.memory_space<vmem>>, %arg10: memref<16x64xf32, #tpu.memory_space<vmem>>, %arg11: memref<2x32xf32, #tpu.memory_space<vmem>>, %arg12: memref<16x32xf32, #tpu.memory_space<vmem>>, %arg13: memref<16x32xf32, #tpu.memory_space<vmem>>, %arg14: memref<2x32xf32, #tpu.memory_space<vmem>>, %arg15: memref<2x32xf32, #tpu.memory_space<vmem>>) attributes {dimension_semantics = [], scalar_prefetch = 0 : i64, scratch_operands = 4 : i64, tpu.core_type = #tpu.core_type<tc>} {
    %c0 = arith.constant 0 : index
    %c0_0 = arith.constant 0 : index
    %0 = vector.load %arg0[%c0, %c0_0] : memref<16x32xf32, #tpu.memory_space<vmem>>, vector<16x32xf32>
    %c0_1 = arith.constant 0 : index
    %c0_2 = arith.constant 0 : index
    %1 = vector.load %arg1[%c0_1, %c0_2] : memref<32x32xf32, #tpu.memory_space<vmem>>, vector<32x32xf32>
    %cst = arith.constant dense<0.000000e+00> : vector<16x32xf32>
    %2 = tpu.matmul %0, %1, %cst {dimension_numbers = #tpu.dot_dimension_numbers<[1], [0], [0], [1], [0, 0, 1, 1], [], []>} : vector<16x32xf32>, vector<32x32xf32>, vector<16x32xf32> -> vector<16x32xf32>
    %c0_3 = arith.constant 0 : index
    %c0_4 = arith.constant 0 : index
    %3 = vector.load %arg3[%c0_3, %c0_4] : memref<1x32xf32, #tpu.memory_space<vmem>>, vector<1x32xf32>
    %4 = vector.broadcast %3 : vector<1x32xf32> to vector<16x32xf32>
    %5 = arith.addf %2, %4 : vector<16x32xf32>
    %c0_5 = arith.constant 0 : index
    %c0_6 = arith.constant 0 : index
    %6 = vector.load %arg12[%c0_5, %c0_6] : memref<16x32xf32, #tpu.memory_space<vmem>>, vector<16x32xf32>
    tpu.vector_store %arg12[%c0_5, %c0_6], %5 {strides = array<i32>} : memref<16x32xf32, #tpu.memory_space<vmem>>, vector<16x32xf32>,
    %c0_7 = arith.constant 0 : index
    %c0_8 = arith.constant 0 : index
    %7 = vector.load %arg2[%c0_7, %c0_8] : memref<32x32xf32, #tpu.memory_space<vmem>>, vector<32x32xf32>
    %cst_9 = arith.constant dense<0.000000e+00> : vector<16x32xf32>
    %8 = tpu.matmul %0, %7, %cst_9 {dimension_numbers = #tpu.dot_dimension_numbers<[1], [0], [0], [1], [0, 0, 1, 1], [], []>} : vector<16x32xf32>, vector<32x32xf32>, vector<16x32xf32> -> vector<16x32xf32>
    %c0_10 = arith.constant 0 : index
    %c0_11 = arith.constant 0 : index
    %9 = vector.load %arg4[%c0_10, %c0_11] : memref<1x32xf32, #tpu.memory_space<vmem>>, vector<1x32xf32>
    %10 = vector.broadcast %9 : vector<1x32xf32> to vector<16x32xf32>
    %11 = arith.addf %8, %10 : vector<16x32xf32>
    %c0_12 = arith.constant 0 : index
    %c0_13 = arith.constant 0 : index
    %12 = vector.load %arg13[%c0_12, %c0_13] : memref<16x32xf32, #tpu.memory_space<vmem>>, vector<16x32xf32>
    tpu.vector_store %arg13[%c0_12, %c0_13], %11 {strides = array<i32>} : memref<16x32xf32, #tpu.memory_space<vmem>>, vector<16x32xf32>,
    %cst_14 = arith.constant 0.000000e+00 : f32
    %13 = vector.broadcast %cst_14 : f32 to vector<2x32xf32>
    %c0_15 = arith.constant 0 : index
    %c0_16 = arith.constant 0 : index
    %14 = vector.load %arg14[%c0_15, %c0_16] : memref<2x32xf32, #tpu.memory_space<vmem>>, vector<2x32xf32>
    tpu.vector_store %arg14[%c0_15, %c0_16], %13 {strides = array<i32>} : memref<2x32xf32, #tpu.memory_space<vmem>>, vector<2x32xf32>,
    %cst_17 = arith.constant 0.000000e+00 : f32
    %15 = vector.broadcast %cst_17 : f32 to vector<2x32xf32>
    %c0_18 = arith.constant 0 : index
    %c0_19 = arith.constant 0 : index
    %16 = vector.load %arg15[%c0_18, %c0_19] : memref<2x32xf32, #tpu.memory_space<vmem>>, vector<2x32xf32>
    tpu.vector_store %arg15[%c0_18, %c0_19], %15 {strides = array<i32>} : memref<2x32xf32, #tpu.memory_space<vmem>>, vector<2x32xf32>,
    %c0_i32 = arith.constant 0 : i32
    %c2_i32 = arith.constant 2 : i32
    %17 = arith.muli %c0_i32, %c2_i32 : i32
    %18 = tpu.assume_multiple %17, 2 : i32
    %c7_i32 = arith.constant 7 : i32
    %19 = arith.subi %c7_i32, %c0_i32 : i32
    %c2_i32_20 = arith.constant 2 : i32
    %20 = arith.muli %19, %c2_i32_20 : i32
    %21 = tpu.assume_multiple %20, 2 : i32
    %22 = arith.index_cast %18 : i32 to index
    %c0_21 = arith.constant 0 : index
    %23 = vector.load %arg12[%22, %c0_21] : memref<16x32xf32, #tpu.memory_space<vmem>>, vector<2x32xf32>
    %c0_22 = arith.constant 0 : index
    %c0_23 = arith.constant 0 : index
    %24 = vector.load %arg14[%c0_22, %c0_23] : memref<2x32xf32, #tpu.memory_space<vmem>>, vector<2x32xf32>
    %c0_24 = arith.constant 0 : index
    %c0_25 = arith.constant 0 : index
    %25 = vector.load %arg5[%c0_24, %c0_25] : memref<32x32xf32, #tpu.memory_space<vmem>>, vector<32x32xf32>
    %cst_26 = arith.constant dense<0.000000e+00> : vector<2x32xf32>
    %26 = tpu.matmul %24, %25, %cst_26 {dimension_numbers = #tpu.dot_dimension_numbers<[1], [0], [0], [1], [0, 0, 1, 1], [], []>} : vector<2x32xf32>, vector<32x32xf32>, vector<2x32xf32> -> vector<2x32xf32>
    %27 = arith.addf %23, %26 : vector<2x32xf32>
    %28 = math.tanh %27 : vector<2x32xf32>
    %29 = arith.index_cast %21 : i32 to index
    %c0_27 = arith.constant 0 : index
    %30 = vector.load %arg13[%29, %c0_27] : memref<16x32xf32, #tpu.memory_space<vmem>>, vector<2x32xf32>
    %c0_28 = arith.constant 0 : index
    %c0_29 = arith.constant 0 : index
    %31 = vector.load %arg15[%c0_28, %c0_29] : memref<2x32xf32, #tpu.memory_space<vmem>>, vector<2x32xf32>
    %c0_30 = arith.constant 0 : index
    %c0_31 = arith.constant 0 : index
    %32 = vector.load %arg6[%c0_30, %c0_31] : memref<32x32xf32, #tpu.memory_space<vmem>>, vector<32x32xf32>
    %cst_32 = arith.constant dense<0.000000e+00> : vector<2x32xf32>
    %33 = tpu.matmul %31, %32, %cst_32 {dimension_numbers = #tpu.dot_dimension_numbers<[1], [0], [0], [1], [0, 0, 1, 1], [], []>} : vector<2x32xf32>, vector<32x32xf32>, vector<2x32xf32> -> vector<2x32xf32>
    %34 = arith.addf %30, %33 : vector<2x32xf32>
    %35 = math.tanh %34 : vector<2x32xf32>
    %c0_33 = arith.constant 0 : index
    %c0_34 = arith.constant 0 : index
    %36 = vector.load %arg14[%c0_33, %c0_34] : memref<2x32xf32, #tpu.memory_space<vmem>>, vector<2x32xf32>
    tpu.vector_store %arg14[%c0_33, %c0_34], %28 {strides = array<i32>} : memref<2x32xf32, #tpu.memory_space<vmem>>, vector<2x32xf32>,
    %c0_35 = arith.constant 0 : index
    %c0_36 = arith.constant 0 : index
    %37 = vector.load %arg15[%c0_35, %c0_36] : memref<2x32xf32, #tpu.memory_space<vmem>>, vector<2x32xf32>
    tpu.vector_store %arg15[%c0_35, %c0_36], %35 {strides = array<i32>} : memref<2x32xf32, #tpu.memory_space<vmem>>, vector<2x32xf32>,
    %38 = arith.index_cast %18 : i32 to index
    %c0_37 = arith.constant 0 : index
    %39 = vector.load %arg12[%38, %c0_37] : memref<16x32xf32, #tpu.memory_space<vmem>>, vector<2x32xf32>
    tpu.vector_store %arg12[%38, %c0_37], %28 {strides = array<i32>} : memref<16x32xf32, #tpu.memory_space<vmem>>, vector<2x32xf32>,
    %40 = arith.index_cast %21 : i32 to index
    %c0_38 = arith.constant 0 : index
    %41 = vector.load %arg13[%40, %c0_38] : memref<16x32xf32, #tpu.memory_space<vmem>>, vector<2x32xf32>
    tpu.vector_store %arg13[%40, %c0_38], %35 {strides = array<i32>} : memref<16x32xf32, #tpu.memory_space<vmem>>, vector<2x32xf32>,
    %c1_i32 = arith.constant 1 : i32
    %c2_i32_39 = arith.constant 2 : i32
    %42 = arith.muli %c1_i32, %c2_i32_39 : i32
    %43 = tpu.assume_multiple %42, 2 : i32
    %c7_i32_40 = arith.constant 7 : i32
    %44 = arith.subi %c7_i32_40, %c1_i32 : i32
    %c2_i32_41 = arith.constant 2 : i32
    %45 = arith.muli %44, %c2_i32_41 : i32
    %46 = tpu.assume_multiple %45, 2 : i32
    %47 = arith.index_cast %43 : i32 to index
    %c0_42 = arith.constant 0 : index
    %48 = vector.load %arg12[%47, %c0_42] : memref<16x32xf32, #tpu.memory_space<vmem>>, vector<2x32xf32>
    %c0_43 = arith.constant 0 : index
    %c0_44 = arith.constant 0 : index
    %49 = vector.load %arg14[%c0_43, %c0_44] : memref<2x32xf32, #tpu.memory_space<vmem>>, vector<2x32xf32>
    %c0_45 = arith.constant 0 : index
    %c0_46 = arith.constant 0 : index
    %50 = vector.load %arg5[%c0_45, %c0_46] : memref<32x32xf32, #tpu.memory_space<vmem>>, vector<32x32xf32>
    %cst_47 = arith.constant dense<0.000000e+00> : vector<2x32xf32>
    %51 = tpu.matmul %49, %50, %cst_47 {dimension_numbers = #tpu.dot_dimension_numbers<[1], [0], [0], [1], [0, 0, 1, 1], [], []>} : vector<2x32xf32>, vector<32x32xf32>, vector<2x32xf32> -> vector<2x32xf32>
    %52 = arith.addf %48, %51 : vector<2x32xf32>
    %53 = math.tanh %52 : vector<2x32xf32>
    %54 = arith.index_cast %46 : i32 to index
    %c0_48 = arith.constant 0 : index
    %55 = vector.load %arg13[%54, %c0_48] : memref<16x32xf32, #tpu.memory_space<vmem>>, vector<2x32xf32>
    %c0_49 = arith.constant 0 : index
    %c0_50 = arith.constant 0 : index
    %56 = vector.load %arg15[%c0_49, %c0_50] : memref<2x32xf32, #tpu.memory_space<vmem>>, vector<2x32xf32>
    %c0_51 = arith.constant 0 : index
    %c0_52 = arith.constant 0 : index
    %57 = vector.load %arg6[%c0_51, %c0_52] : memref<32x32xf32, #tpu.memory_space<vmem>>, vector<32x32xf32>
    %cst_53 = arith.constant dense<0.000000e+00> : vector<2x32xf32>
    %58 = tpu.matmul %56, %57, %cst_53 {dimension_numbers = #tpu.dot_dimension_numbers<[1], [0], [0], [1], [0, 0, 1, 1], [], []>} : vector<2x32xf32>, vector<32x32xf32>, vector<2x32xf32> -> vector<2x32xf32>
    %59 = arith.addf %55, %58 : vector<2x32xf32>
    %60 = math.tanh %59 : vector<2x32xf32>
    %c0_54 = arith.constant 0 : index
    %c0_55 = arith.constant 0 : index
    %61 = vector.load %arg14[%c0_54, %c0_55] : memref<2x32xf32, #tpu.memory_space<vmem>>, vector<2x32xf32>
    tpu.vector_store %arg14[%c0_54, %c0_55], %53 {strides = array<i32>} : memref<2x32xf32, #tpu.memory_space<vmem>>, vector<2x32xf32>,
    %c0_56 = arith.constant 0 : index
    %c0_57 = arith.constant 0 : index
    %62 = vector.load %arg15[%c0_56, %c0_57] : memref<2x32xf32, #tpu.memory_space<vmem>>, vector<2x32xf32>
    tpu.vector_store %arg15[%c0_56, %c0_57], %60 {strides = array<i32>} : memref<2x32xf32, #tpu.memory_space<vmem>>, vector<2x32xf32>,
    %63 = arith.index_cast %43 : i32 to index
    %c0_58 = arith.constant 0 : index
    %64 = vector.load %arg12[%63, %c0_58] : memref<16x32xf32, #tpu.memory_space<vmem>>, vector<2x32xf32>
    tpu.vector_store %arg12[%63, %c0_58], %53 {strides = array<i32>} : memref<16x32xf32, #tpu.memory_space<vmem>>, vector<2x32xf32>,
    %65 = arith.index_cast %46 : i32 to index
    %c0_59 = arith.constant 0 : index
    %66 = vector.load %arg13[%65, %c0_59] : memref<16x32xf32, #tpu.memory_space<vmem>>, vector<2x32xf32>
    tpu.vector_store %arg13[%65, %c0_59], %60 {strides = array<i32>} : memref<16x32xf32, #tpu.memory_space<vmem>>, vector<2x32xf32>,
    %c2_i32_60 = arith.constant 2 : i32
    %c2_i32_61 = arith.constant 2 : i32
    %67 = arith.muli %c2_i32_60, %c2_i32_61 : i32
    %68 = tpu.assume_multiple %67, 2 : i32
    %c7_i32_62 = arith.constant 7 : i32
    %69 = arith.subi %c7_i32_62, %c2_i32_60 : i32
    %c2_i32_63 = arith.constant 2 : i32
    %70 = arith.muli %69, %c2_i32_63 : i32
    %71 = tpu.assume_multiple %70, 2 : i32
    %72 = arith.index_cast %68 : i32 to index
    %c0_64 = arith.constant 0 : index
    %73 = vector.load %arg12[%72, %c0_64] : memref<16x32xf32, #tpu.memory_space<vmem>>, vector<2x32xf32>
    %c0_65 = arith.constant 0 : index
    %c0_66 = arith.constant 0 : index
    %74 = vector.load %arg14[%c0_65, %c0_66] : memref<2x32xf32, #tpu.memory_space<vmem>>, vector<2x32xf32>
    %c0_67 = arith.constant 0 : index
    %c0_68 = arith.constant 0 : index
    %75 = vector.load %arg5[%c0_67, %c0_68] : memref<32x32xf32, #tpu.memory_space<vmem>>, vector<32x32xf32>
    %cst_69 = arith.constant dense<0.000000e+00> : vector<2x32xf32>
    %76 = tpu.matmul %74, %75, %cst_69 {dimension_numbers = #tpu.dot_dimension_numbers<[1], [0], [0], [1], [0, 0, 1, 1], [], []>} : vector<2x32xf32>, vector<32x32xf32>, vector<2x32xf32> -> vector<2x32xf32>
    %77 = arith.addf %73, %76 : vector<2x32xf32>
    %78 = math.tanh %77 : vector<2x32xf32>
    %79 = arith.index_cast %71 : i32 to index
    %c0_70 = arith.constant 0 : index
    %80 = vector.load %arg13[%79, %c0_70] : memref<16x32xf32, #tpu.memory_space<vmem>>, vector<2x32xf32>
    %c0_71 = arith.constant 0 : index
    %c0_72 = arith.constant 0 : index
    %81 = vector.load %arg15[%c0_71, %c0_72] : memref<2x32xf32, #tpu.memory_space<vmem>>, vector<2x32xf32>
    %c0_73 = arith.constant 0 : index
    %c0_74 = arith.constant 0 : index
    %82 = vector.load %arg6[%c0_73, %c0_74] : memref<32x32xf32, #tpu.memory_space<vmem>>, vector<32x32xf32>
    %cst_75 = arith.constant dense<0.000000e+00> : vector<2x32xf32>
    %83 = tpu.matmul %81, %82, %cst_75 {dimension_numbers = #tpu.dot_dimension_numbers<[1], [0], [0], [1], [0, 0, 1, 1], [], []>} : vector<2x32xf32>, vector<32x32xf32>, vector<2x32xf32> -> vector<2x32xf32>
    %84 = arith.addf %80, %83 : vector<2x32xf32>
    %85 = math.tanh %84 : vector<2x32xf32>
    %c0_76 = arith.constant 0 : index
    %c0_77 = arith.constant 0 : index
    %86 = vector.load %arg14[%c0_76, %c0_77] : memref<2x32xf32, #tpu.memory_space<vmem>>, vector<2x32xf32>
    tpu.vector_store %arg14[%c0_76, %c0_77], %78 {strides = array<i32>} : memref<2x32xf32, #tpu.memory_space<vmem>>, vector<2x32xf32>,
    %c0_78 = arith.constant 0 : index
    %c0_79 = arith.constant 0 : index
    %87 = vector.load %arg15[%c0_78, %c0_79] : memref<2x32xf32, #tpu.memory_space<vmem>>, vector<2x32xf32>
    tpu.vector_store %arg15[%c0_78, %c0_79], %85 {strides = array<i32>} : memref<2x32xf32, #tpu.memory_space<vmem>>, vector<2x32xf32>,
    %88 = arith.index_cast %68 : i32 to index
    %c0_80 = arith.constant 0 : index
    %89 = vector.load %arg12[%88, %c0_80] : memref<16x32xf32, #tpu.memory_space<vmem>>, vector<2x32xf32>
    tpu.vector_store %arg12[%88, %c0_80], %78 {strides = array<i32>} : memref<16x32xf32, #tpu.memory_space<vmem>>, vector<2x32xf32>,
    %90 = arith.index_cast %71 : i32 to index
    %c0_81 = arith.constant 0 : index
    %91 = vector.load %arg13[%90, %c0_81] : memref<16x32xf32, #tpu.memory_space<vmem>>, vector<2x32xf32>
    tpu.vector_store %arg13[%90, %c0_81], %85 {strides = array<i32>} : memref<16x32xf32, #tpu.memory_space<vmem>>, vector<2x32xf32>,
    %c3_i32 = arith.constant 3 : i32
    %c2_i32_82 = arith.constant 2 : i32
    %92 = arith.muli %c3_i32, %c2_i32_82 : i32
    %93 = tpu.assume_multiple %92, 2 : i32
    %c7_i32_83 = arith.constant 7 : i32
    %94 = arith.subi %c7_i32_83, %c3_i32 : i32
    %c2_i32_84 = arith.constant 2 : i32
    %95 = arith.muli %94, %c2_i32_84 : i32
    %96 = tpu.assume_multiple %95, 2 : i32
    %97 = arith.index_cast %93 : i32 to index
    %c0_85 = arith.constant 0 : index
    %98 = vector.load %arg12[%97, %c0_85] : memref<16x32xf32, #tpu.memory_space<vmem>>, vector<2x32xf32>
    %c0_86 = arith.constant 0 : index
    %c0_87 = arith.constant 0 : index
    %99 = vector.load %arg14[%c0_86, %c0_87] : memref<2x32xf32, #tpu.memory_space<vmem>>, vector<2x32xf32>
    %c0_88 = arith.constant 0 : index
    %c0_89 = arith.constant 0 : index
    %100 = vector.load %arg5[%c0_88, %c0_89] : memref<32x32xf32, #tpu.memory_space<vmem>>, vector<32x32xf32>
    %cst_90 = arith.constant dense<0.000000e+00> : vector<2x32xf32>
    %101 = tpu.matmul %99, %100, %cst_90 {dimension_numbers = #tpu.dot_dimension_numbers<[1], [0], [0], [1], [0, 0, 1, 1], [], []>} : vector<2x32xf32>, vector<32x32xf32>, vector<2x32xf32> -> vector<2x32xf32>
    %102 = arith.addf %98, %101 : vector<2x32xf32>
    %103 = math.tanh %102 : vector<2x32xf32>
    %104 = arith.index_cast %96 : i32 to index
    %c0_91 = arith.constant 0 : index
    %105 = vector.load %arg13[%104, %c0_91] : memref<16x32xf32, #tpu.memory_space<vmem>>, vector<2x32xf32>
    %c0_92 = arith.constant 0 : index
    %c0_93 = arith.constant 0 : index
    %106 = vector.load %arg15[%c0_92, %c0_93] : memref<2x32xf32, #tpu.memory_space<vmem>>, vector<2x32xf32>
    %c0_94 = arith.constant 0 : index
    %c0_95 = arith.constant 0 : index
    %107 = vector.load %arg6[%c0_94, %c0_95] : memref<32x32xf32, #tpu.memory_space<vmem>>, vector<32x32xf32>
    %cst_96 = arith.constant dense<0.000000e+00> : vector<2x32xf32>
    %108 = tpu.matmul %106, %107, %cst_96 {dimension_numbers = #tpu.dot_dimension_numbers<[1], [0], [0], [1], [0, 0, 1, 1], [], []>} : vector<2x32xf32>, vector<32x32xf32>, vector<2x32xf32> -> vector<2x32xf32>
    %109 = arith.addf %105, %108 : vector<2x32xf32>
    %110 = math.tanh %109 : vector<2x32xf32>
    %c0_97 = arith.constant 0 : index
    %c0_98 = arith.constant 0 : index
    %111 = vector.load %arg14[%c0_97, %c0_98] : memref<2x32xf32, #tpu.memory_space<vmem>>, vector<2x32xf32>
    tpu.vector_store %arg14[%c0_97, %c0_98], %103 {strides = array<i32>} : memref<2x32xf32, #tpu.memory_space<vmem>>, vector<2x32xf32>,
    %c0_99 = arith.constant 0 : index
    %c0_100 = arith.constant 0 : index
    %112 = vector.load %arg15[%c0_99, %c0_100] : memref<2x32xf32, #tpu.memory_space<vmem>>, vector<2x32xf32>
    tpu.vector_store %arg15[%c0_99, %c0_100], %110 {strides = array<i32>} : memref<2x32xf32, #tpu.memory_space<vmem>>, vector<2x32xf32>,
    %113 = arith.index_cast %93 : i32 to index
    %c0_101 = arith.constant 0 : index
    %114 = vector.load %arg12[%113, %c0_101] : memref<16x32xf32, #tpu.memory_space<vmem>>, vector<2x32xf32>
    tpu.vector_store %arg12[%113, %c0_101], %103 {strides = array<i32>} : memref<16x32xf32, #tpu.memory_space<vmem>>, vector<2x32xf32>,
    %115 = arith.index_cast %96 : i32 to index
    %c0_102 = arith.constant 0 : index
    %116 = vector.load %arg13[%115, %c0_102] : memref<16x32xf32, #tpu.memory_space<vmem>>, vector<2x32xf32>
    tpu.vector_store %arg13[%115, %c0_102], %110 {strides = array<i32>} : memref<16x32xf32, #tpu.memory_space<vmem>>, vector<2x32xf32>,
    %c4_i32 = arith.constant 4 : i32
    %c2_i32_103 = arith.constant 2 : i32
    %117 = arith.muli %c4_i32, %c2_i32_103 : i32
    %118 = tpu.assume_multiple %117, 2 : i32
    %c7_i32_104 = arith.constant 7 : i32
    %119 = arith.subi %c7_i32_104, %c4_i32 : i32
    %c2_i32_105 = arith.constant 2 : i32
    %120 = arith.muli %119, %c2_i32_105 : i32
    %121 = tpu.assume_multiple %120, 2 : i32
    %122 = arith.index_cast %118 : i32 to index
    %c0_106 = arith.constant 0 : index
    %123 = vector.load %arg12[%122, %c0_106] : memref<16x32xf32, #tpu.memory_space<vmem>>, vector<2x32xf32>
    %c0_107 = arith.constant 0 : index
    %c0_108 = arith.constant 0 : index
    %124 = vector.load %arg14[%c0_107, %c0_108] : memref<2x32xf32, #tpu.memory_space<vmem>>, vector<2x32xf32>
    %c0_109 = arith.constant 0 : index
    %c0_110 = arith.constant 0 : index
    %125 = vector.load %arg5[%c0_109, %c0_110] : memref<32x32xf32, #tpu.memory_space<vmem>>, vector<32x32xf32>
    %cst_111 = arith.constant dense<0.000000e+00> : vector<2x32xf32>
    %126 = tpu.matmul %124, %125, %cst_111 {dimension_numbers = #tpu.dot_dimension_numbers<[1], [0], [0], [1], [0, 0, 1, 1], [], []>} : vector<2x32xf32>, vector<32x32xf32>, vector<2x32xf32> -> vector<2x32xf32>
    %127 = arith.addf %123, %126 : vector<2x32xf32>
    %128 = math.tanh %127 : vector<2x32xf32>
    %129 = arith.index_cast %121 : i32 to index
    %c0_112 = arith.constant 0 : index
    %130 = vector.load %arg13[%129, %c0_112] : memref<16x32xf32, #tpu.memory_space<vmem>>, vector<2x32xf32>
    %c0_113 = arith.constant 0 : index
    %c0_114 = arith.constant 0 : index
    %131 = vector.load %arg15[%c0_113, %c0_114] : memref<2x32xf32, #tpu.memory_space<vmem>>, vector<2x32xf32>
    %c0_115 = arith.constant 0 : index
    %c0_116 = arith.constant 0 : index
    %132 = vector.load %arg6[%c0_115, %c0_116] : memref<32x32xf32, #tpu.memory_space<vmem>>, vector<32x32xf32>
    %cst_117 = arith.constant dense<0.000000e+00> : vector<2x32xf32>
    %133 = tpu.matmul %131, %132, %cst_117 {dimension_numbers = #tpu.dot_dimension_numbers<[1], [0], [0], [1], [0, 0, 1, 1], [], []>} : vector<2x32xf32>, vector<32x32xf32>, vector<2x32xf32> -> vector<2x32xf32>
    %134 = arith.addf %130, %133 : vector<2x32xf32>
    %135 = math.tanh %134 : vector<2x32xf32>
    %c0_118 = arith.constant 0 : index
    %c0_119 = arith.constant 0 : index
    %136 = vector.load %arg14[%c0_118, %c0_119] : memref<2x32xf32, #tpu.memory_space<vmem>>, vector<2x32xf32>
    tpu.vector_store %arg14[%c0_118, %c0_119], %128 {strides = array<i32>} : memref<2x32xf32, #tpu.memory_space<vmem>>, vector<2x32xf32>,
    %c0_120 = arith.constant 0 : index
    %c0_121 = arith.constant 0 : index
    %137 = vector.load %arg15[%c0_120, %c0_121] : memref<2x32xf32, #tpu.memory_space<vmem>>, vector<2x32xf32>
    tpu.vector_store %arg15[%c0_120, %c0_121], %135 {strides = array<i32>} : memref<2x32xf32, #tpu.memory_space<vmem>>, vector<2x32xf32>,
    %138 = arith.index_cast %118 : i32 to index
    %c0_122 = arith.constant 0 : index
    %139 = vector.load %arg12[%138, %c0_122] : memref<16x32xf32, #tpu.memory_space<vmem>>, vector<2x32xf32>
    tpu.vector_store %arg12[%138, %c0_122], %128 {strides = array<i32>} : memref<16x32xf32, #tpu.memory_space<vmem>>, vector<2x32xf32>,
    %140 = arith.index_cast %121 : i32 to index
    %c0_123 = arith.constant 0 : index
    %141 = vector.load %arg13[%140, %c0_123] : memref<16x32xf32, #tpu.memory_space<vmem>>, vector<2x32xf32>
    tpu.vector_store %arg13[%140, %c0_123], %135 {strides = array<i32>} : memref<16x32xf32, #tpu.memory_space<vmem>>, vector<2x32xf32>,
    %c5_i32 = arith.constant 5 : i32
    %c2_i32_124 = arith.constant 2 : i32
    %142 = arith.muli %c5_i32, %c2_i32_124 : i32
    %143 = tpu.assume_multiple %142, 2 : i32
    %c7_i32_125 = arith.constant 7 : i32
    %144 = arith.subi %c7_i32_125, %c5_i32 : i32
    %c2_i32_126 = arith.constant 2 : i32
    %145 = arith.muli %144, %c2_i32_126 : i32
    %146 = tpu.assume_multiple %145, 2 : i32
    %147 = arith.index_cast %143 : i32 to index
    %c0_127 = arith.constant 0 : index
    %148 = vector.load %arg12[%147, %c0_127] : memref<16x32xf32, #tpu.memory_space<vmem>>, vector<2x32xf32>
    %c0_128 = arith.constant 0 : index
    %c0_129 = arith.constant 0 : index
    %149 = vector.load %arg14[%c0_128, %c0_129] : memref<2x32xf32, #tpu.memory_space<vmem>>, vector<2x32xf32>
    %c0_130 = arith.constant 0 : index
    %c0_131 = arith.constant 0 : index
    %150 = vector.load %arg5[%c0_130, %c0_131] : memref<32x32xf32, #tpu.memory_space<vmem>>, vector<32x32xf32>
    %cst_132 = arith.constant dense<0.000000e+00> : vector<2x32xf32>
    %151 = tpu.matmul %149, %150, %cst_132 {dimension_numbers = #tpu.dot_dimension_numbers<[1], [0], [0], [1], [0, 0, 1, 1], [], []>} : vector<2x32xf32>, vector<32x32xf32>, vector<2x32xf32> -> vector<2x32xf32>
    %152 = arith.addf %148, %151 : vector<2x32xf32>
    %153 = math.tanh %152 : vector<2x32xf32>
    %154 = arith.index_cast %146 : i32 to index
    %c0_133 = arith.constant 0 : index
    %155 = vector.load %arg13[%154, %c0_133] : memref<16x32xf32, #tpu.memory_space<vmem>>, vector<2x32xf32>
    %c0_134 = arith.constant 0 : index
    %c0_135 = arith.constant 0 : index
    %156 = vector.load %arg15[%c0_134, %c0_135] : memref<2x32xf32, #tpu.memory_space<vmem>>, vector<2x32xf32>
    %c0_136 = arith.constant 0 : index
    %c0_137 = arith.constant 0 : index
    %157 = vector.load %arg6[%c0_136, %c0_137] : memref<32x32xf32, #tpu.memory_space<vmem>>, vector<32x32xf32>
    %cst_138 = arith.constant dense<0.000000e+00> : vector<2x32xf32>
    %158 = tpu.matmul %156, %157, %cst_138 {dimension_numbers = #tpu.dot_dimension_numbers<[1], [0], [0], [1], [0, 0, 1, 1], [], []>} : vector<2x32xf32>, vector<32x32xf32>, vector<2x32xf32> -> vector<2x32xf32>
    %159 = arith.addf %155, %158 : vector<2x32xf32>
    %160 = math.tanh %159 : vector<2x32xf32>
    %c0_139 = arith.constant 0 : index
    %c0_140 = arith.constant 0 : index
    %161 = vector.load %arg14[%c0_139, %c0_140] : memref<2x32xf32, #tpu.memory_space<vmem>>, vector<2x32xf32>
    tpu.vector_store %arg14[%c0_139, %c0_140], %153 {strides = array<i32>} : memref<2x32xf32, #tpu.memory_space<vmem>>, vector<2x32xf32>,
    %c0_141 = arith.constant 0 : index
    %c0_142 = arith.constant 0 : index
    %162 = vector.load %arg15[%c0_141, %c0_142] : memref<2x32xf32, #tpu.memory_space<vmem>>, vector<2x32xf32>
    tpu.vector_store %arg15[%c0_141, %c0_142], %160 {strides = array<i32>} : memref<2x32xf32, #tpu.memory_space<vmem>>, vector<2x32xf32>,
    %163 = arith.index_cast %143 : i32 to index
    %c0_143 = arith.constant 0 : index
    %164 = vector.load %arg12[%163, %c0_143] : memref<16x32xf32, #tpu.memory_space<vmem>>, vector<2x32xf32>
    tpu.vector_store %arg12[%163, %c0_143], %153 {strides = array<i32>} : memref<16x32xf32, #tpu.memory_space<vmem>>, vector<2x32xf32>,
    %165 = arith.index_cast %146 : i32 to index
    %c0_144 = arith.constant 0 : index
    %166 = vector.load %arg13[%165, %c0_144] : memref<16x32xf32, #tpu.memory_space<vmem>>, vector<2x32xf32>
    tpu.vector_store %arg13[%165, %c0_144], %160 {strides = array<i32>} : memref<16x32xf32, #tpu.memory_space<vmem>>, vector<2x32xf32>,
    %c6_i32 = arith.constant 6 : i32
    %c2_i32_145 = arith.constant 2 : i32
    %167 = arith.muli %c6_i32, %c2_i32_145 : i32
    %168 = tpu.assume_multiple %167, 2 : i32
    %c7_i32_146 = arith.constant 7 : i32
    %169 = arith.subi %c7_i32_146, %c6_i32 : i32
    %c2_i32_147 = arith.constant 2 : i32
    %170 = arith.muli %169, %c2_i32_147 : i32
    %171 = tpu.assume_multiple %170, 2 : i32
    %172 = arith.index_cast %168 : i32 to index
    %c0_148 = arith.constant 0 : index
    %173 = vector.load %arg12[%172, %c0_148] : memref<16x32xf32, #tpu.memory_space<vmem>>, vector<2x32xf32>
    %c0_149 = arith.constant 0 : index
    %c0_150 = arith.constant 0 : index
    %174 = vector.load %arg14[%c0_149, %c0_150] : memref<2x32xf32, #tpu.memory_space<vmem>>, vector<2x32xf32>
    %c0_151 = arith.constant 0 : index
    %c0_152 = arith.constant 0 : index
    %175 = vector.load %arg5[%c0_151, %c0_152] : memref<32x32xf32, #tpu.memory_space<vmem>>, vector<32x32xf32>
    %cst_153 = arith.constant dense<0.000000e+00> : vector<2x32xf32>
    %176 = tpu.matmul %174, %175, %cst_153 {dimension_numbers = #tpu.dot_dimension_numbers<[1], [0], [0], [1], [0, 0, 1, 1], [], []>} : vector<2x32xf32>, vector<32x32xf32>, vector<2x32xf32> -> vector<2x32xf32>
    %177 = arith.addf %173, %176 : vector<2x32xf32>
    %178 = math.tanh %177 : vector<2x32xf32>
    %179 = arith.index_cast %171 : i32 to index
    %c0_154 = arith.constant 0 : index
    %180 = vector.load %arg13[%179, %c0_154] : memref<16x32xf32, #tpu.memory_space<vmem>>, vector<2x32xf32>
    %c0_155 = arith.constant 0 : index
    %c0_156 = arith.constant 0 : index
    %181 = vector.load %arg15[%c0_155, %c0_156] : memref<2x32xf32, #tpu.memory_space<vmem>>, vector<2x32xf32>
    %c0_157 = arith.constant 0 : index
    %c0_158 = arith.constant 0 : index
    %182 = vector.load %arg6[%c0_157, %c0_158] : memref<32x32xf32, #tpu.memory_space<vmem>>, vector<32x32xf32>
    %cst_159 = arith.constant dense<0.000000e+00> : vector<2x32xf32>
    %183 = tpu.matmul %181, %182, %cst_159 {dimension_numbers = #tpu.dot_dimension_numbers<[1], [0], [0], [1], [0, 0, 1, 1], [], []>} : vector<2x32xf32>, vector<32x32xf32>, vector<2x32xf32> -> vector<2x32xf32>
    %184 = arith.addf %180, %183 : vector<2x32xf32>
    %185 = math.tanh %184 : vector<2x32xf32>
    %c0_160 = arith.constant 0 : index
    %c0_161 = arith.constant 0 : index
    %186 = vector.load %arg14[%c0_160, %c0_161] : memref<2x32xf32, #tpu.memory_space<vmem>>, vector<2x32xf32>
    tpu.vector_store %arg14[%c0_160, %c0_161], %178 {strides = array<i32>} : memref<2x32xf32, #tpu.memory_space<vmem>>, vector<2x32xf32>,
    %c0_162 = arith.constant 0 : index
    %c0_163 = arith.constant 0 : index
    %187 = vector.load %arg15[%c0_162, %c0_163] : memref<2x32xf32, #tpu.memory_space<vmem>>, vector<2x32xf32>
    tpu.vector_store %arg15[%c0_162, %c0_163], %185 {strides = array<i32>} : memref<2x32xf32, #tpu.memory_space<vmem>>, vector<2x32xf32>,
    %188 = arith.index_cast %168 : i32 to index
    %c0_164 = arith.constant 0 : index
    %189 = vector.load %arg12[%188, %c0_164] : memref<16x32xf32, #tpu.memory_space<vmem>>, vector<2x32xf32>
    tpu.vector_store %arg12[%188, %c0_164], %178 {strides = array<i32>} : memref<16x32xf32, #tpu.memory_space<vmem>>, vector<2x32xf32>,
    %190 = arith.index_cast %171 : i32 to index
    %c0_165 = arith.constant 0 : index
    %191 = vector.load %arg13[%190, %c0_165] : memref<16x32xf32, #tpu.memory_space<vmem>>, vector<2x32xf32>
    tpu.vector_store %arg13[%190, %c0_165], %185 {strides = array<i32>} : memref<16x32xf32, #tpu.memory_space<vmem>>, vector<2x32xf32>,
    %c7_i32_166 = arith.constant 7 : i32
    %c2_i32_167 = arith.constant 2 : i32
    %192 = arith.muli %c7_i32_166, %c2_i32_167 : i32
    %193 = tpu.assume_multiple %192, 2 : i32
    %c7_i32_168 = arith.constant 7 : i32
    %194 = arith.subi %c7_i32_168, %c7_i32_166 : i32
    %c2_i32_169 = arith.constant 2 : i32
    %195 = arith.muli %194, %c2_i32_169 : i32
    %196 = tpu.assume_multiple %195, 2 : i32
    %197 = arith.index_cast %193 : i32 to index
    %c0_170 = arith.constant 0 : index
    %198 = vector.load %arg12[%197, %c0_170] : memref<16x32xf32, #tpu.memory_space<vmem>>, vector<2x32xf32>
    %c0_171 = arith.constant 0 : index
    %c0_172 = arith.constant 0 : index
    %199 = vector.load %arg14[%c0_171, %c0_172] : memref<2x32xf32, #tpu.memory_space<vmem>>, vector<2x32xf32>
    %c0_173 = arith.constant 0 : index
    %c0_174 = arith.constant 0 : index
    %200 = vector.load %arg5[%c0_173, %c0_174] : memref<32x32xf32, #tpu.memory_space<vmem>>, vector<32x32xf32>
    %cst_175 = arith.constant dense<0.000000e+00> : vector<2x32xf32>
    %201 = tpu.matmul %199, %200, %cst_175 {dimension_numbers = #tpu.dot_dimension_numbers<[1], [0], [0], [1], [0, 0, 1, 1], [], []>} : vector<2x32xf32>, vector<32x32xf32>, vector<2x32xf32> -> vector<2x32xf32>
    %202 = arith.addf %198, %201 : vector<2x32xf32>
    %203 = math.tanh %202 : vector<2x32xf32>
    %204 = arith.index_cast %196 : i32 to index
    %c0_176 = arith.constant 0 : index
    %205 = vector.load %arg13[%204, %c0_176] : memref<16x32xf32, #tpu.memory_space<vmem>>, vector<2x32xf32>
    %c0_177 = arith.constant 0 : index
    %c0_178 = arith.constant 0 : index
    %206 = vector.load %arg15[%c0_177, %c0_178] : memref<2x32xf32, #tpu.memory_space<vmem>>, vector<2x32xf32>
    %c0_179 = arith.constant 0 : index
    %c0_180 = arith.constant 0 : index
    %207 = vector.load %arg6[%c0_179, %c0_180] : memref<32x32xf32, #tpu.memory_space<vmem>>, vector<32x32xf32>
    %cst_181 = arith.constant dense<0.000000e+00> : vector<2x32xf32>
    %208 = tpu.matmul %206, %207, %cst_181 {dimension_numbers = #tpu.dot_dimension_numbers<[1], [0], [0], [1], [0, 0, 1, 1], [], []>} : vector<2x32xf32>, vector<32x32xf32>, vector<2x32xf32> -> vector<2x32xf32>
    %209 = arith.addf %205, %208 : vector<2x32xf32>
    %210 = math.tanh %209 : vector<2x32xf32>
    %c0_182 = arith.constant 0 : index
    %c0_183 = arith.constant 0 : index
    %211 = vector.load %arg14[%c0_182, %c0_183] : memref<2x32xf32, #tpu.memory_space<vmem>>, vector<2x32xf32>
    tpu.vector_store %arg14[%c0_182, %c0_183], %203 {strides = array<i32>} : memref<2x32xf32, #tpu.memory_space<vmem>>, vector<2x32xf32>,
    %c0_184 = arith.constant 0 : index
    %c0_185 = arith.constant 0 : index
    %212 = vector.load %arg15[%c0_184, %c0_185] : memref<2x32xf32, #tpu.memory_space<vmem>>, vector<2x32xf32>
    tpu.vector_store %arg15[%c0_184, %c0_185], %210 {strides = array<i32>} : memref<2x32xf32, #tpu.memory_space<vmem>>, vector<2x32xf32>,
    %213 = arith.index_cast %193 : i32 to index
    %c0_186 = arith.constant 0 : index
    %214 = vector.load %arg12[%213, %c0_186] : memref<16x32xf32, #tpu.memory_space<vmem>>, vector<2x32xf32>
    tpu.vector_store %arg12[%213, %c0_186], %203 {strides = array<i32>} : memref<16x32xf32, #tpu.memory_space<vmem>>, vector<2x32xf32>,
    %215 = arith.index_cast %196 : i32 to index
    %c0_187 = arith.constant 0 : index
    %216 = vector.load %arg13[%215, %c0_187] : memref<16x32xf32, #tpu.memory_space<vmem>>, vector<2x32xf32>
    tpu.vector_store %arg13[%215, %c0_187], %210 {strides = array<i32>} : memref<16x32xf32, #tpu.memory_space<vmem>>, vector<2x32xf32>,
    %c8_i32 = arith.constant 8 : i32
    %c0_188 = arith.constant 0 : index
    %c0_189 = arith.constant 0 : index
    %217 = vector.load %arg12[%c0_188, %c0_189] : memref<16x32xf32, #tpu.memory_space<vmem>>, vector<16x32xf32>
    %c0_190 = arith.constant 0 : index
    %c0_191 = arith.constant 0 : index
    %218 = vector.load %arg13[%c0_190, %c0_191] : memref<16x32xf32, #tpu.memory_space<vmem>>, vector<16x32xf32>
    %219 = tpu.concatenate %217, %218 in 1 : vector<16x32xf32>, vector<16x32xf32> -> vector<16x64xf32>
    %c0_192 = arith.constant 0 : index
    %c0_193 = arith.constant 0 : index
    %220 = vector.load %arg10[%c0_192, %c0_193] : memref<16x64xf32, #tpu.memory_space<vmem>>, vector<16x64xf32>
    tpu.vector_store %arg10[%c0_192, %c0_193], %219 {strides = array<i32>} : memref<16x64xf32, #tpu.memory_space<vmem>>, vector<16x64xf32>,
    %c0_194 = arith.constant 0 : index
    %c0_195 = arith.constant 0 : index
    %221 = vector.load %arg14[%c0_194, %c0_195] : memref<2x32xf32, #tpu.memory_space<vmem>>, vector<2x32xf32>
    %c0_196 = arith.constant 0 : index
    %c0_197 = arith.constant 0 : index
    %222 = vector.load %arg7[%c0_196, %c0_197] : memref<32x32xf32, #tpu.memory_space<vmem>>, vector<32x32xf32>
    %cst_198 = arith.constant dense<0.000000e+00> : vector<2x32xf32>
    %223 = tpu.matmul %221, %222, %cst_198 {dimension_numbers = #tpu.dot_dimension_numbers<[1], [0], [0], [1], [0, 0, 1, 1], [], []>} : vector<2x32xf32>, vector<32x32xf32>, vector<2x32xf32> -> vector<2x32xf32>
    %c0_199 = arith.constant 0 : index
    %c0_200 = arith.constant 0 : index
    %224 = vector.load %arg15[%c0_199, %c0_200] : memref<2x32xf32, #tpu.memory_space<vmem>>, vector<2x32xf32>
    %c0_201 = arith.constant 0 : index
    %c0_202 = arith.constant 0 : index
    %225 = vector.load %arg8[%c0_201, %c0_202] : memref<32x32xf32, #tpu.memory_space<vmem>>, vector<32x32xf32>
    %cst_203 = arith.constant dense<0.000000e+00> : vector<2x32xf32>
    %226 = tpu.matmul %224, %225, %cst_203 {dimension_numbers = #tpu.dot_dimension_numbers<[1], [0], [0], [1], [0, 0, 1, 1], [], []>} : vector<2x32xf32>, vector<32x32xf32>, vector<2x32xf32> -> vector<2x32xf32>
    %227 = arith.addf %223, %226 : vector<2x32xf32>
    %c0_204 = arith.constant 0 : index
    %c0_205 = arith.constant 0 : index
    %228 = vector.load %arg9[%c0_204, %c0_205] : memref<1x32xf32, #tpu.memory_space<vmem>>, vector<1x32xf32>
    %229 = vector.broadcast %228 : vector<1x32xf32> to vector<2x32xf32>
    %230 = arith.addf %227, %229 : vector<2x32xf32>
    %231 = math.tanh %230 : vector<2x32xf32>
    %c0_206 = arith.constant 0 : index
    %c0_207 = arith.constant 0 : index
    %232 = vector.load %arg11[%c0_206, %c0_207] : memref<2x32xf32, #tpu.memory_space<vmem>>, vector<2x32xf32>
    tpu.vector_store %arg11[%c0_206, %c0_207], %231 {strides = array<i32>} : memref<2x32xf32, #tpu.memory_space<vmem>>, vector<2x32xf32>,
    return
  }
}

</mosaic_0001>

<bundles_post_ra>
// kernel: encoder_forward.1
= control target key start
LH: loop header
LB: loop body
LE: loop exit
PB: predicated region body
PF: predicated region fallthrough
CT: control target
= control target key end

     0   :  { %17 = vsyncpa [#allocation7], 0  ;;  %vm224_vm0 = vcmask 254976   ;;  %v2214_v6 = vmov 0.0   ;;  %vm52_vm1 = vcmask 261120   ;;  %s2627_s0 = inlined_call_operand.vmem [shape: f32[16,32], index: 0, kind: input, shape index: {}]   ;;  %s2628_s1 = inlined_call_operand.vmem [shape: f32[32,32], index: 1, kind: input, shape index: {}]   ;;  %s2629_s2 = inlined_call_operand.vmem [shape: f32[32,32], index: 2, kind: input, shape index: {}]   ;;  %s2630_s3 = inlined_call_operand.vmem [shape: f32[1,32], index: 3, kind: input, shape index: {}]   ;;  %s2631_s4 = inlined_call_operand.vmem [shape: f32[1,32], index: 4, kind: input, shape index: {}]   ;;  %s2632_s5 = inlined_call_operand.vmem [shape: f32[32,32], index: 5, kind: input, shape index: {}]   ;;  %s2633_s6 = inlined_call_operand.vmem [shape: f32[32,32], index: 6, kind: input, shape index: {}]   ;;  %s2634_s7 = inlined_call_operand.vmem [shape: f32[32,32], index: 7, kind: input, shape index: {}]   ;;  %s2635_s8 = inlined_call_operand.vmem [shape: f32[32,32], index: 8, kind: input, shape index: {}]   ;;  %s2636_s9 = inlined_call_operand.vmem [shape: f32[1,32], index: 9, kind: input, shape index: {}]   ;;  %s2637_s10 = inlined_call_operand.hbm [shape: f32[16,64], index: 10, kind: output, shape index: {0}]   ;;  %s2638_s11 = inlined_call_operand.hbm [shape: f32[2,32], index: 11, kind: output, shape index: {1}]  }
   0x1   :  { %v44_v0 = vld [vmem:[%s2628_s1 + $0x18] sm:$0xff]  ;;  %v43_v2 = vld [vmem:[%s2628_s1 + $0x10] sm:$0xff]  ;;  %v42_v4 = vld [vmem:[%s2628_s1 + $0x8] sm:$0xff]  ;;  %225 = vst.msk [vmem:[#allocation4] sm:$0x3] %vm224_vm0, %v2214_v6 }
   0x2   :  { %v139_v1 = vld [vmem:[%s2629_s2 + $0x18] sm:$0xff]  ;;  %1909 = vmatprep.subr.mxu0 %v44_v0  ;;  %v138_v3 = vld [vmem:[%s2629_s2 + $0x10] sm:$0xff]  ;;  %v137_v5 = vld [vmem:[%s2629_s2 + $0x8] sm:$0xff]  ;;  %226 = vst.msk [vmem:[#allocation5] sm:$0x3] %vm224_vm0, %v2214_v6 }
   0x3   :  { %1920 = vmatprep.subr.mxu1 %v139_v1  ;;  %1910 = vmatpush3.msra.mxu0 %v44_v0  ;;  %v41_v7 = vld [vmem:[%s2628_s1] sm:$0xff] }
   0x4   :  { %1921 = vmatpush3.msra.mxu1 %v139_v1  ;;  %1911 = vmatprep.subr.mxu0 %v43_v2  ;;  %v136_v8 = vld [vmem:[%s2629_s2] sm:$0xff] }
   0x5   :  { %1922 = vmatprep.subr.mxu1 %v138_v3  ;;  %1912 = vmatpush3.msra.mxu0 %v43_v2  ;;  %v39_v9 = vld [vmem:[%s2627_s0] sm:$0xff] }
   0x6   :  { %1923 = vmatpush3.msra.mxu1 %v138_v3  ;;  %1913 = vmatprep.subr.mxu0 %v42_v4 }
   0x7   :  { %1924 = vmatprep.subr.mxu1 %v137_v5  ;;  %1914 = vmatpush3.msra.mxu0 %v42_v4 }
   0x8   :  { %1925 = vmatpush3.msra.mxu1 %v137_v5 }
   0x9   :  { %18 = vsyncpa [#allocation9], 0  ;;  %1915 = vmatprep.subr.mxu0 %v41_v7  ;;  %1926 = vmatprep.subr.mxu1 %v136_v8  ;;  %v40_v10 = vld [vmem:[%s2627_s0 + $0x8] sm:$0xff]  ;;  %v2320_v11 = vld [vmem:[%s2632_s5 + $0x18] sm:$0xff]  ;;  %vm2215_vm2 = vmmov 0   ;;  %vm1583_vm3 = vcmask 523264  }
   0xa   :  { %1916 = vmatpush3.msra.mxu0 %v41_v7  ;;  %1917 = vmatprep.mubr.msk.f32.mxu0 %vm52_vm1, %v39_v9  ;;  %v2325_v12 = vld [vmem:[%s2633_s6 + $0x18] sm:$0xff]  ;;  %v2334_v13 = vld [vmem:[%s2632_s5 + $0x10] sm:$0xff]  ;;  %v2348_v15 = vld [vmem:[%s2632_s5 + $0x8] sm:$0xff] }
   0xb   :  { %1927 = vmatpush3.msra.mxu1 %v136_v8  ;;  %1928 = vmatprep.mubr.msk.f32.mxu1 %vm52_vm1, %v39_v9  ;;  %v2339_v14 = vld [vmem:[%s2633_s6 + $0x10] sm:$0xff]  ;;  %v2353_v16 = vld [vmem:[%s2633_s6 + $0x8] sm:$0xff]  ;;  %v2362_v17 = vld [vmem:[%s2632_s5] sm:$0xff] }
   0xc   :  { %1918 = vmatmul.mubr.msk.f32.vlgmr.msra.gmra.mxu0 %vm52_vm1, %v40_v10  ;;  %1929 = vmatmul.mubr.msk.f32.vlgmr.msra.gmra.mxu1 %vm52_vm1, %v40_v10  ;;  %v2369_v18 = vld [vmem:[%s2633_s6] sm:$0xff] }
   0xd   :  { %1931 = vmatprep.subr.mxu0 %v2214_v6  ;;  %1942 = vmatprep.subr.mxu1 %v2214_v6  ;;  %v228_v19 = vld [vmem:[#allocation4] sm:$0x3]  ;;  %v310_v20 = vld [vmem:[#allocation5] sm:$0x3] }
   0xe   :  { %1932 = vmatpush3.msra.mxu0 %v2320_v11  ;;  %1943 = vmatpush3.msra.mxu1 %v2325_v12  ;;  %v1782_v21 = vld [vmem:[%s2630_s3] ss:$0 sm:$0xff] }
   0xf   :  { %1933 = vmatprep.subr.mxu0 %v2214_v6  ;;  %1944 = vmatprep.subr.mxu1 %v2214_v6  ;;  %v1785_v22 = vld [vmem:[%s2631_s4] ss:$0 sm:$0xff] }
  0x10   :  { %1934 = vmatpush3.msra.mxu0 %v2334_v13  ;;  %1945 = vmatpush3.msra.mxu1 %v2339_v14 }
  0x11   :  { %1935 = vmatprep.subr.mxu0 %v2214_v6  ;;  %1946 = vmatprep.subr.mxu1 %v2214_v6 }
  0x12   :  { %1936 = vmatpush3.msra.mxu0 %v2348_v15  ;;  %1947 = vmatpush3.msra.mxu1 %v2353_v16 }
  0x13   :  { %1937 = vmatprep.subr.mxu0 %v2214_v6  ;;  %1948 = vmatprep.subr.mxu1 %v2214_v6 }
  0x14   :  { %1938 = vmatpush3.msra.mxu0 %v2362_v17  ;;  %1939 = vmatprep.mubr.msk.f32.mxu0 %vm2215_vm2, %v2214_v6 }
  0x15   :  { %1949 = vmatpush3.msra.mxu1 %v2369_v18  ;;  %1950 = vmatprep.mubr.msk.f32.mxu1 %vm2215_vm2, %v2214_v6 }
  0x16   :  { %1940 = vmatmul.mubr.msk.f32.vlgmr.msra.gmra.mxu0 %vm52_vm1, %v228_v19  ;;  %1951 = vmatmul.mubr.msk.f32.vlgmr.msra.gmra.mxu1 %vm52_vm1, %v310_v20 }
  0x17   :  { %1964 = vmatprep.subr.mxu1 %v2214_v6  ;;  %1953 = vmatprep.subr.mxu0 %v2214_v6 }
  0x18   :  { %1965 = vmatpush3.msra.mxu1 %v2325_v12  ;;  %1954 = vmatpush3.msra.mxu0 %v2320_v11 }
  0x19   :  { %1966 = vmatprep.subr.mxu1 %v2214_v6  ;;  %1955 = vmatprep.subr.mxu0 %v2214_v6 }
  0x1a   :  { %1967 = vmatpush3.msra.mxu1 %v2339_v14  ;;  %1956 = vmatpush3.msra.mxu0 %v2334_v13 }
  0x1b   :  { %1968 = vmatprep.subr.mxu1 %v2214_v6  ;;  %1957 = vmatprep.subr.mxu0 %v2214_v6 }
  0x1c   :  { %1969 = vmatpush3.msra.mxu1 %v2353_v16  ;;  %1958 = vmatpush3.msra.mxu0 %v2348_v15 }
  0x1d   :  { %1970 = vmatprep.subr.mxu1 %v2214_v6  ;;  %1972 = vmatprep.mubr.msk.f32.mxu1 %vm2215_vm2, %v2214_v6 }
  0x1e   :  { %1971 = vmatpush3.msra.mxu1 %v2369_v18  ;;  %1959 = vmatprep.subr.mxu0 %v2214_v6 }
  0x1f   :  { %1960 = vmatpush3.msra.mxu0 %v2362_v17  ;;  %1961 = vmatprep.mubr.msk.f32.mxu0 %vm2215_vm2, %v2214_v6 }
  0x20   :  { %1986 = vmatprep.subr.mxu1 %v2214_v6  ;;  %1975 = vmatprep.subr.mxu0 %v2214_v6 }
  0xcc   :  { %v1919_v23 = vpop.f32.mrf.mxu0  ;;  %v1930_v24 = vpop.f32.mrf.mxu1 }
  0xcd   :  { %v131_v25 = vadd.f32 %v1919_v23, %v1782_v21  ;;  %v219_v26 = vadd.f32 %v1930_v24, %v1785_v22 }
  0xce   :  { %v125_v27 = vpop.f32.mrf.mxu0  ;;  %v213_v28 = vpop.f32.mrf.mxu1 }
  0xcf   :  { %135 = vst.msk [vmem:[#allocation2 + $0x8] sm:$0xff] %vm52_vm1, %v131_v25  ;;  %223 = vst.msk [vmem:[#allocation3 + $0x8] sm:$0xff] %vm52_vm1, %v219_v26  ;;  %v126_v29 = vadd.f32 %v1782_v21, %v125_v27  ;;  %v214_v30 = vadd.f32 %v1785_v22, %v213_v28 }
  0xd1   :  { %134 = vst.msk [vmem:[#allocation2] sm:$0xff] %vm52_vm1, %v126_v29  ;;  %222 = vst.msk [vmem:[#allocation3] sm:$0xff] %vm52_vm1, %v214_v30 }
  0xd6   :  { %v302_v31 = vpop.f32.mrf.mxu0  ;;  %v309_v32 = vld [vmem:[#allocation3 + $0xe] sm:$0x3]  ;;  %v384_v33 = vpop.f32.mrf.mxu1  ;;  %v477_v43 = vld [vmem:[#allocation3 + $0xc] sm:$0x3]  ;;  %v645_v55 = vld [vmem:[#allocation3 + $0xa] sm:$0x3] }
  0xd7   :  { %v388_v34 = vadd.f32 %v384_v33, %v309_v32  ;;  %v813_v3 = vld [vmem:[#allocation3 + $0x8] sm:$0x3]  ;;  %v899_v27 = vld [vmem:[#allocation2 + $0x8] sm:$0x3] }
  0xd8   :  { %v227_v35 = vld [vmem:[#allocation2] sm:$0x3]  ;;  %v1941_v36 = vpop.f32.mrf.mxu0  ;;  %v1952_v37 = vpop.f32.mrf.mxu1  ;;  %v395_v46 = vld [vmem:[#allocation2 + $0x2] sm:$0x3]  ;;  %v563_v58 = vld [vmem:[#allocation2 + $0x4] sm:$0x3] }
  0xd9   :  { %v306_v38 = vadd.f32 %v302_v31, %v227_v35  ;;  %2136 = vtanh.f32 %v388_v34  ;;  %v731_v7 = vld [vmem:[#allocation2 + $0x6] sm:$0x3]  ;;  %v981_v24 = vld [vmem:[#allocation3 + $0x6] sm:$0x3]  ;;  %v1149_v36 = vld [vmem:[#allocation3 + $0x4] sm:$0x3] }
  0xdb   :  { %2138 = vtanh.f32 %v306_v38 }
  0xe6   :  { %v2137_v39 = vpop.eup %2136 }
  0xe7   :  { %393 = vst.msk [vmem:[#allocation3 + $0xe] sm:$0x3] %vm224_vm0, %v2137_v39  ;;  %391 = vst.msk [vmem:[#allocation5] sm:$0x3] %vm224_vm0, %v2137_v39  ;;  %v1067_v39 = vld [vmem:[#allocation2 + $0xa] sm:$0x3] }
  0xe8   :  { %v2139_v40 = vpop.eup %2138 }
  0xe9   :  { %392 = vst.msk [vmem:[#allocation2] sm:$0x3] %vm224_vm0, %v2139_v40  ;;  %390 = vst.msk [vmem:[#allocation4] sm:$0x3] %vm224_vm0, %v2139_v40 }
  0xee   :  { %v478_v41 = vld [vmem:[#allocation5] sm:$0x3] }
  0xef   :  { %1973 = vmatmul.mubr.msk.f32.vlgmr.msra.gmra.mxu1 %vm52_vm1, %v478_v41 }
  0xf0   :  { %v396_v42 = vld [vmem:[#allocation4] sm:$0x3]  ;;  %1987 = vmatpush3.msra.mxu1 %v2325_v12  ;;  %1994 = vmatprep.mubr.msk.f32.mxu1 %vm2215_vm2, %v2214_v6 }
  0xf1   :  { %1962 = vmatmul.mubr.msk.f32.vlgmr.msra.gmra.mxu0 %vm52_vm1, %v396_v42  ;;  %1988 = vmatprep.subr.mxu1 %v2214_v6 }
  0xf2   :  { %1976 = vmatpush3.msra.mxu0 %v2320_v11  ;;  %1989 = vmatpush3.msra.mxu1 %v2339_v14 }
  0xf3   :  { %1977 = vmatprep.subr.mxu0 %v2214_v6  ;;  %1990 = vmatprep.subr.mxu1 %v2214_v6 }
  0xf4   :  { %1978 = vmatpush3.msra.mxu0 %v2334_v13  ;;  %1991 = vmatpush3.msra.mxu1 %v2353_v16 }
  0xf5   :  { %1979 = vmatprep.subr.mxu0 %v2214_v6  ;;  %1992 = vmatprep.subr.mxu1 %v2214_v6 }
  0xf6   :  { %1980 = vmatpush3.msra.mxu0 %v2348_v15  ;;  %1993 = vmatpush3.msra.mxu1 %v2369_v18 }
  0xf7   :  { %1981 = vmatprep.subr.mxu0 %v2214_v6  ;;  %1983 = vmatprep.mubr.msk.f32.mxu0 %vm2215_vm2, %v2214_v6 }
  0xf8   :  { %1982 = vmatpush3.msra.mxu0 %v2362_v17  ;;  %2008 = vmatprep.subr.mxu1 %v2214_v6 }
  0xf9   :  { %1997 = vmatprep.subr.mxu0 %v2214_v6 }
 0x1af   :  { %v552_v44 = vpop.f32.mrf.mxu1 }
 0x1b0   :  { %v556_v45 = vadd.f32 %v552_v44, %v477_v43 }
 0x1b1   :  { %v470_v47 = vpop.f32.mrf.mxu0  ;;  %v1974_v48 = vpop.f32.mrf.mxu1 }
 0x1b2   :  { %2140 = vtanh.f32 %v556_v45  ;;  %v474_v49 = vadd.f32 %v470_v47, %v395_v46 }
 0x1b3   :  { %v1963_v50 = vpop.f32.mrf.mxu0 }
 0x1b4   :  { %2142 = vtanh.f32 %v474_v49 }
 0x1bf   :  { %v2141_v51 = vpop.eup %2140 }
 0x1c0   :  { %561 = vst.msk [vmem:[#allocation3 + $0xc] sm:$0x3] %vm224_vm0, %v2141_v51  ;;  %559 = vst.msk [vmem:[#allocation5] sm:$0x3] %vm224_vm0, %v2141_v51 }
 0x1c1   :  { %v2143_v52 = vpop.eup %2142 }
 0x1c2   :  { %560 = vst.msk [vmem:[#allocation2 + $0x2] sm:$0x3] %vm224_vm0, %v2143_v52  ;;  %558 = vst.msk [vmem:[#allocation4] sm:$0x3] %vm224_vm0, %v2143_v52  ;;  %v1595_v52 = vld [vmem:[%s2635_s8 + $0x18] sm:$0xff] }
 0x1c7   :  { %v646_v53 = vld [vmem:[#allocation5] sm:$0x3] }
 0x1c8   :  { %1995 = vmatmul.mubr.msk.f32.vlgmr.msra.gmra.mxu1 %vm52_vm1, %v646_v53  ;;  %v1594_v53 = vld [vmem:[%s2635_s8 + $0x10] sm:$0xff] }
 0x1c9   :  { %v564_v54 = vld [vmem:[#allocation4] sm:$0x3]  ;;  %2009 = vmatpush3.msra.mxu1 %v2325_v12  ;;  %2016 = vmatprep.mubr.msk.f32.mxu1 %vm2215_vm2, %v2214_v6 }
 0x1ca   :  { %1984 = vmatmul.mubr.msk.f32.vlgmr.msra.gmra.mxu0 %vm52_vm1, %v564_v54  ;;  %2010 = vmatprep.subr.mxu1 %v2214_v6  ;;  %v1590_v54 = vld [vmem:[%s2634_s7 + $0x18] sm:$0xff] }
 0x1cb   :  { %1998 = vmatpush3.msra.mxu0 %v2320_v11  ;;  %2011 = vmatpush3.msra.mxu1 %v2339_v14 }
 0x1cc   :  { %1999 = vmatprep.subr.mxu0 %v2214_v6  ;;  %2012 = vmatprep.subr.mxu1 %v2214_v6 }
 0x1cd   :  { %2000 = vmatpush3.msra.mxu0 %v2334_v13  ;;  %2013 = vmatpush3.msra.mxu1 %v2353_v16 }
 0x1ce   :  { %2001 = vmatprep.subr.mxu0 %v2214_v6  ;;  %2014 = vmatprep.subr.mxu1 %v2214_v6 }
 0x1cf   :  { %2002 = vmatpush3.msra.mxu0 %v2348_v15  ;;  %2015 = vmatpush3.msra.mxu1 %v2369_v18 }
 0x1d0   :  { %2003 = vmatprep.subr.mxu0 %v2214_v6  ;;  %2005 = vmatprep.mubr.msk.f32.mxu0 %vm2215_vm2, %v2214_v6 }
 0x1d1   :  { %2004 = vmatpush3.msra.mxu0 %v2362_v17  ;;  %2030 = vmatprep.subr.mxu1 %v2214_v6 }
 0x1d2   :  { %2019 = vmatprep.subr.mxu0 %v2214_v6 }
 0x288   :  { %v720_v56 = vpop.f32.mrf.mxu1 }
 0x289   :  { %v724_v57 = vadd.f32 %v720_v56, %v645_v55  ;;  %v1589_v55 = vld [vmem:[%s2634_s7 + $0x10] sm:$0xff]  ;;  %v1593_v56 = vld [vmem:[%s2635_s8 + $0x8] sm:$0xff] }
 0x28a   :  { %v638_v59 = vpop.f32.mrf.mxu0  ;;  %v1996_v60 = vpop.f32.mrf.mxu1 }
 0x28b   :  { %2144 = vtanh.f32 %v724_v57  ;;  %v642_v61 = vadd.f32 %v638_v59, %v563_v58  ;;  %v1588_v57 = vld [vmem:[%s2634_s7 + $0x8] sm:$0xff]  ;;  %v1592_v58 = vld [vmem:[%s2635_s8] sm:$0xff]  ;;  %v1484_v60 = vld [vmem:[#allocation3] sm:$0x3]  ;;  %s2217_s8 = smov [#allocation6]  }
 0x28c   :  { %v1985_v62 = vpop.f32.mrf.mxu0  ;;  %v1587_v59 = vld [vmem:[%s2634_s7] sm:$0xff]  ;;  %s2216_s7 = smov 32   ;;  %s1757_s25 = sshll.u32 %s2217_s8, 4  ;;  %s1758_s25 = int_to_ptr.vmem [resolvable:$true] %s1757_s25 }
 0x28d   :  { %2146 = vtanh.f32 %v642_v61  ;;  %s2170_s26 = scalar_lea.vmem %s1758_s25, 256  ;;  %p2175_p1 = scmp.lt.s32.totalorder %s1758_s25, %s1758_s25 }
 0x28e   :  { %p2171_p0 = scmp.ne.s32.totalorder %s1758_s25, %s2170_s26  ;;  %p2176_p2 = scmp.lt.s32.totalorder %s2170_s26, %s2170_s26 }
 0x290   :  { %p2177_p3 = por %p2176_p2, %p2175_p1 }
 0x292   :  { %p2178_p4 = pnand %p2177_p3, %p2171_p0 }
 0x298   :  { %v2145_v63 = vpop.eup %2144 }
 0x299   :  { %729 = vst.msk [vmem:[#allocation3 + $0xa] sm:$0x3] %vm224_vm0, %v2145_v63  ;;  %727 = vst.msk [vmem:[#allocation5] sm:$0x3] %vm224_vm0, %v2145_v63  ;;  %v1403_v63 = vld [vmem:[#allocation2 + $0xe] sm:$0x3] }
 0x29a   :  { %v2147_v0 = vpop.eup %2146 }
 0x29b   :  { %728 = vst.msk [vmem:[#allocation2 + $0x4] sm:$0x3] %vm224_vm0, %v2147_v0  ;;  %726 = vst.msk [vmem:[#allocation4] sm:$0x3] %vm224_vm0, %v2147_v0 }
 0x2a0   :  { %v814_v1 = vld [vmem:[#allocation5] sm:$0x3] }
 0x2a1   :  { %2017 = vmatmul.mubr.msk.f32.vlgmr.msra.gmra.mxu1 %vm52_vm1, %v814_v1 }
 0x2a2   :  { %v732_v2 = vld [vmem:[#allocation4] sm:$0x3]  ;;  %2031 = vmatpush3.msra.mxu1 %v2325_v12  ;;  %2038 = vmatprep.mubr.msk.f32.mxu1 %vm2215_vm2, %v2214_v6 }
 0x2a3   :  { %2006 = vmatmul.mubr.msk.f32.vlgmr.msra.gmra.mxu0 %vm52_vm1, %v732_v2  ;;  %2032 = vmatprep.subr.mxu1 %v2214_v6 }
 0x2a4   :  { %2020 = vmatpush3.msra.mxu0 %v2320_v11  ;;  %2033 = vmatpush3.msra.mxu1 %v2339_v14 }
 0x2a5   :  { %2021 = vmatprep.subr.mxu0 %v2214_v6  ;;  %2034 = vmatprep.subr.mxu1 %v2214_v6 }
 0x2a6   :  { %2022 = vmatpush3.msra.mxu0 %v2334_v13  ;;  %2035 = vmatpush3.msra.mxu1 %v2353_v16 }
 0x2a7   :  { %2023 = vmatprep.subr.mxu0 %v2214_v6  ;;  %2036 = vmatprep.subr.mxu1 %v2214_v6 }
 0x2a8   :  { %2024 = vmatpush3.msra.mxu0 %v2348_v15  ;;  %2037 = vmatpush3.msra.mxu1 %v2369_v18 }
 0x2a9   :  { %2025 = vmatprep.subr.mxu0 %v2214_v6  ;;  %2027 = vmatprep.mubr.msk.f32.mxu0 %vm2215_vm2, %v2214_v6 }
 0x2aa   :  { %2026 = vmatpush3.msra.mxu0 %v2362_v17  ;;  %2052 = vmatprep.subr.mxu1 %v2214_v6 }
 0x2ab   :  { %2041 = vmatprep.subr.mxu0 %v2214_v6 }
 0x361   :  { %v888_v4 = vpop.f32.mrf.mxu1 }
 0x362   :  { %v892_v5 = vadd.f32 %v888_v4, %v813_v3 }
 0x363   :  { %v806_v8 = vpop.f32.mrf.mxu0  ;;  %v2018_v9 = vpop.f32.mrf.mxu1 }
 0x364   :  { %2148 = vtanh.f32 %v892_v5  ;;  %v810_v10 = vadd.f32 %v806_v8, %v731_v7 }
 0x365   :  { %v2007_v19 = vpop.f32.mrf.mxu0 }
 0x366   :  { %2150 = vtanh.f32 %v810_v10 }
 0x371   :  { %v2149_v20 = vpop.eup %2148 }
 0x372   :  { %897 = vst.msk [vmem:[#allocation3 + $0x8] sm:$0x3] %vm224_vm0, %v2149_v20  ;;  %895 = vst.msk [vmem:[#allocation5] sm:$0x3] %vm224_vm0, %v2149_v20 }
 0x373   :  { %v2151_v21 = vpop.eup %2150 }
 0x374   :  { %896 = vst.msk [vmem:[#allocation2 + $0x6] sm:$0x3] %vm224_vm0, %v2151_v21  ;;  %894 = vst.msk [vmem:[#allocation4] sm:$0x3] %vm224_vm0, %v2151_v21 }
 0x379   :  { %v982_v22 = vld [vmem:[#allocation5] sm:$0x3]  ;;  %v1572_v9 = vld [vmem:[#allocation3 + $0x8] sm:$0xff] }
 0x37a   :  { %2039 = vmatmul.mubr.msk.f32.vlgmr.msra.gmra.mxu1 %vm52_vm1, %v982_v22 }
 0x37b   :  { %v900_v23 = vld [vmem:[#allocation4] sm:$0x3]  ;;  %2053 = vmatpush3.msra.mxu1 %v2325_v12  ;;  %2060 = vmatprep.mubr.msk.f32.mxu1 %vm2215_vm2, %v2214_v6 }
 0x37c   :  { %2028 = vmatmul.mubr.msk.f32.vlgmr.msra.gmra.mxu0 %vm52_vm1, %v900_v23  ;;  %2054 = vmatprep.subr.mxu1 %v2214_v6  ;;  %v1569_v19 = vld [vmem:[#allocation2] sm:$0xff] }
 0x37d   :  { %2042 = vmatpush3.msra.mxu0 %v2320_v11  ;;  %2055 = vmatpush3.msra.mxu1 %v2339_v14 }
 0x37e   :  { %2043 = vmatprep.subr.mxu0 %v2214_v6  ;;  %2056 = vmatprep.subr.mxu1 %v2214_v6 }
 0x37f   :  { %2044 = vmatpush3.msra.mxu0 %v2334_v13  ;;  %2057 = vmatpush3.msra.mxu1 %v2353_v16 }
 0x380   :  { %2045 = vmatprep.subr.mxu0 %v2214_v6  ;;  %2058 = vmatprep.subr.mxu1 %v2214_v6 }
 0x381   :  { %2046 = vmatpush3.msra.mxu0 %v2348_v15  ;;  %2059 = vmatpush3.msra.mxu1 %v2369_v18 }
 0x382   :  { %2047 = vmatprep.subr.mxu0 %v2214_v6  ;;  %2049 = vmatprep.mubr.msk.f32.mxu0 %vm2215_vm2, %v2214_v6 }
 0x383   :  { %2048 = vmatpush3.msra.mxu0 %v2362_v17  ;;  %2074 = vmatprep.subr.mxu1 %v2214_v6 }
 0x384   :  { %2063 = vmatprep.subr.mxu0 %v2214_v6 }
 0x43a   :  { %v1056_v25 = vpop.f32.mrf.mxu1 }
 0x43b   :  { %v1060_v26 = vadd.f32 %v1056_v25, %v981_v24 }
 0x43c   :  { %v974_v28 = vpop.f32.mrf.mxu0  ;;  %v2040_v29 = vpop.f32.mrf.mxu1 }
 0x43d   :  { %2152 = vtanh.f32 %v1060_v26  ;;  %v978_v30 = vadd.f32 %v974_v28, %v899_v27 }
 0x43e   :  { %v2029_v31 = vpop.f32.mrf.mxu0 }
 0x43f   :  { %2154 = vtanh.f32 %v978_v30 }
 0x44a   :  { %v2153_v32 = vpop.eup %2152 }
 0x44b   :  { %1065 = vst.msk [vmem:[#allocation3 + $0x6] sm:$0x3] %vm224_vm0, %v2153_v32  ;;  %1063 = vst.msk [vmem:[#allocation5] sm:$0x3] %vm224_vm0, %v2153_v32 }
 0x44c   :  { %v2155_v33 = vpop.eup %2154 }
 0x44d   :  { %1064 = vst.msk [vmem:[#allocation2 + $0x8] sm:$0x3] %vm224_vm0, %v2155_v33  ;;  %1062 = vst.msk [vmem:[#allocation4] sm:$0x3] %vm224_vm0, %v2155_v33 }
 0x452   :  { %v1150_v34 = vld [vmem:[#allocation5] sm:$0x3] }
 0x453   :  { %2061 = vmatmul.mubr.msk.f32.vlgmr.msra.gmra.mxu1 %vm52_vm1, %v1150_v34 }
 0x454   :  { %v1068_v35 = vld [vmem:[#allocation4] sm:$0x3]  ;;  %2075 = vmatpush3.msra.mxu1 %v2325_v12  ;;  %2082 = vmatprep.mubr.msk.f32.mxu1 %vm2215_vm2, %v2214_v6 }
 0x455   :  { %2050 = vmatmul.mubr.msk.f32.vlgmr.msra.gmra.mxu0 %vm52_vm1, %v1068_v35  ;;  %2076 = vmatprep.subr.mxu1 %v2214_v6 }
 0x456   :  { %2064 = vmatpush3.msra.mxu0 %v2320_v11  ;;  %2077 = vmatpush3.msra.mxu1 %v2339_v14 }
 0x457   :  { %2065 = vmatprep.subr.mxu0 %v2214_v6  ;;  %2078 = vmatprep.subr.mxu1 %v2214_v6 }
 0x458   :  { %2066 = vmatpush3.msra.mxu0 %v2334_v13  ;;  %2079 = vmatpush3.msra.mxu1 %v2353_v16 }
 0x459   :  { %2067 = vmatprep.subr.mxu0 %v2214_v6  ;;  %2080 = vmatprep.subr.mxu1 %v2214_v6 }
 0x45a   :  { %2068 = vmatpush3.msra.mxu0 %v2348_v15  ;;  %2081 = vmatpush3.msra.mxu1 %v2369_v18 }
 0x45b   :  { %2069 = vmatprep.subr.mxu0 %v2214_v6  ;;  %2071 = vmatprep.mubr.msk.f32.mxu0 %vm2215_vm2, %v2214_v6 }
 0x45c   :  { %2070 = vmatpush3.msra.mxu0 %v2362_v17  ;;  %2096 = vmatprep.subr.mxu1 %v2214_v6 }
 0x45d   :  { %2085 = vmatprep.subr.mxu0 %v2214_v6 }
 0x513   :  { %v1224_v37 = vpop.f32.mrf.mxu1 }
 0x514   :  { %v1228_v38 = vadd.f32 %v1224_v37, %v1149_v36 }
 0x515   :  { %v1142_v40 = vpop.f32.mrf.mxu0  ;;  %v2062_v41 = vpop.f32.mrf.mxu1 }
 0x516   :  { %2156 = vtanh.f32 %v1228_v38  ;;  %v1146_v42 = vadd.f32 %v1142_v40, %v1067_v39 }
 0x517   :  { %v2051_v43 = vpop.f32.mrf.mxu0 }
 0x518   :  { %2158 = vtanh.f32 %v1146_v42 }
 0x523   :  { %v2157_v44 = vpop.eup %2156 }
 0x524   :  { %1233 = vst.msk [vmem:[#allocation3 + $0x4] sm:$0x3] %vm224_vm0, %v2157_v44  ;;  %1231 = vst.msk [vmem:[#allocation5] sm:$0x3] %vm224_vm0, %v2157_v44 }
 0x525   :  { %v2159_v45 = vpop.eup %2158 }
 0x526   :  { %1232 = vst.msk [vmem:[#allocation2 + $0xa] sm:$0x3] %vm224_vm0, %v2159_v45  ;;  %1230 = vst.msk [vmem:[#allocation4] sm:$0x3] %vm224_vm0, %v2159_v45 }
 0x52b   :  { %v1318_v46 = vld [vmem:[#allocation5] sm:$0x3] }
 0x52c   :  { %2083 = vmatmul.mubr.msk.f32.vlgmr.msra.gmra.mxu1 %vm52_vm1, %v1318_v46 }
 0x52d   :  { %v1236_v47 = vld [vmem:[#allocation4] sm:$0x3]  ;;  %2097 = vmatpush3.msra.mxu1 %v2325_v12  ;;  %2104 = vmatprep.mubr.msk.f32.mxu1 %vm2215_vm2, %v2214_v6 }
 0x52e   :  { %2072 = vmatmul.mubr.msk.f32.vlgmr.msra.gmra.mxu0 %vm52_vm1, %v1236_v47  ;;  %2098 = vmatprep.subr.mxu1 %v2214_v6 }
 0x52f   :  { %2086 = vmatpush3.msra.mxu0 %v2320_v11  ;;  %2099 = vmatpush3.msra.mxu1 %v2339_v14  ;;  %v1317_v11 = vld [vmem:[#allocation3 + $0x2] sm:$0x3]  ;;  %v1235_v14 = vld [vmem:[#allocation2 + $0xc] sm:$0x3] }
 0x530   :  { %2087 = vmatprep.subr.mxu0 %v2214_v6  ;;  %2100 = vmatprep.subr.mxu1 %v2214_v6 }
 0x531   :  { %2088 = vmatpush3.msra.mxu0 %v2334_v13  ;;  %2101 = vmatpush3.msra.mxu1 %v2353_v16 }
 0x532   :  { %2089 = vmatprep.subr.mxu0 %v2214_v6  ;;  %2102 = vmatprep.subr.mxu1 %v2214_v6 }
 0x533   :  { %2090 = vmatpush3.msra.mxu0 %v2348_v15  ;;  %2103 = vmatpush3.msra.mxu1 %v2369_v18 }
 0x534   :  { %2091 = vmatprep.subr.mxu0 %v2214_v6  ;;  %2093 = vmatprep.mubr.msk.f32.mxu0 %vm2215_vm2, %v2214_v6 }
 0x535   :  { %2092 = vmatpush3.msra.mxu0 %v2362_v17  ;;  %2118 = vmatprep.subr.mxu1 %v2214_v6 }
 0x536   :  { %2107 = vmatprep.subr.mxu0 %v2214_v6 }
 0x5ec   :  { %v1392_v12 = vpop.f32.mrf.mxu1 }
 0x5ed   :  { %v1396_v13 = vadd.f32 %v1392_v12, %v1317_v11 }
 0x5ee   :  { %v1310_v16 = vpop.f32.mrf.mxu0  ;;  %v2084_v48 = vpop.f32.mrf.mxu1 }
 0x5ef   :  { %2160 = vtanh.f32 %v1396_v13  ;;  %v1314_v15 = vadd.f32 %v1310_v16, %v1235_v14 }
 0x5f0   :  { %v2073_v18 = vpop.f32.mrf.mxu0 }
 0x5f1   :  { %2162 = vtanh.f32 %v1314_v15 }
 0x5fc   :  { %v2161_v49 = vpop.eup %2160 }
 0x5fd   :  { %1401 = vst.msk [vmem:[#allocation3 + $0x2] sm:$0x3] %vm224_vm0, %v2161_v49  ;;  %1399 = vst.msk [vmem:[#allocation5] sm:$0x3] %vm224_vm0, %v2161_v49 }
 0x5fe   :  { %v2163_v17 = vpop.eup %2162 }
 0x5ff   :  { %1400 = vst.msk [vmem:[#allocation2 + $0xc] sm:$0x3] %vm224_vm0, %v2163_v17  ;;  %1398 = vst.msk [vmem:[#allocation4] sm:$0x3] %vm224_vm0, %v2163_v17 }
 0x604   :  { %v1485_v50 = vld [vmem:[#allocation5] sm:$0x3] }
 0x605   :  { %2105 = vmatmul.mubr.msk.f32.vlgmr.msra.gmra.mxu1 %vm52_vm1, %v1485_v50 }
 0x606   :  { %v1404_v51 = vld [vmem:[#allocation4] sm:$0x3]  ;;  %2126 = vmatprep.mubr.msk.f32.mxu1 %vm2215_vm2, %v2214_v6  ;;  %2119 = vmatpush3.msra.mxu1 %v1590_v54 }
 0x607   :  { %2094 = vmatmul.mubr.msk.f32.vlgmr.msra.gmra.mxu0 %vm52_vm1, %v1404_v51  ;;  %2120 = vmatprep.subr.mxu1 %v2214_v6 }
 0x608   :  { %2115 = vmatprep.mubr.msk.f32.mxu0 %vm2215_vm2, %v2214_v6  ;;  %2108 = vmatpush3.msra.mxu0 %v1595_v52 }
 0x609   :  { %2109 = vmatprep.subr.mxu0 %v2214_v6  ;;  %2121 = vmatpush3.msra.mxu1 %v1589_v55 }
 0x60a   :  { %2110 = vmatpush3.msra.mxu0 %v1594_v53  ;;  %2122 = vmatprep.subr.mxu1 %v2214_v6 }
 0x60b   :  { %2111 = vmatprep.subr.mxu0 %v2214_v6  ;;  %2123 = vmatpush3.msra.mxu1 %v1588_v57 }
 0x60c   :  { %2112 = vmatpush3.msra.mxu0 %v1593_v56  ;;  %2124 = vmatprep.subr.mxu1 %v2214_v6 }
 0x60d   :  { %2113 = vmatprep.subr.mxu0 %v2214_v6  ;;  %2125 = vmatpush3.msra.mxu1 %v1587_v59 }
 0x60e   :  { %2114 = vmatpush3.msra.mxu0 %v1592_v58 }
 0x6c5   :  { %v1559_v61 = vpop.f32.mrf.mxu1 }
 0x6c6   :  { %v1563_v62 = vadd.f32 %v1559_v61, %v1484_v60 }
 0x6c7   :  { %v1478_v0 = vpop.f32.mrf.mxu0  ;;  %v2106_v1 = vpop.f32.mrf.mxu1 }
 0x6c8   :  { %2164 = vtanh.f32 %v1563_v62  ;;  %v1482_v2 = vadd.f32 %v1478_v0, %v1403_v63 }
 0x6c9   :  { %v2095_v3 = vpop.f32.mrf.mxu0 }
 0x6ca   :  { %2166 = vtanh.f32 %v1482_v2 }
 0x6d5   :  { %v2165_v4 = vpop.eup %2164 }
 0x6d6   :  { %1568 = vst.msk [vmem:[#allocation3] sm:$0x3] %vm224_vm0, %v2165_v4  ;;  %1566 = vst.msk [vmem:[#allocation5] sm:$0x3] %vm224_vm0, %v2165_v4 }
 0x6d7   :  { %v2167_v6 = vpop.eup %2166 }
 0x6d8   :  { %1567 = vst.msk [vmem:[#allocation2 + $0xe] sm:$0x3] %vm224_vm0, %v2167_v6  ;;  %1565 = vst.msk [vmem:[#allocation4] sm:$0x3] %vm224_vm0, %v2167_v6 }
 0x6dd   :  { %v1571_v5 = vld [vmem:[#allocation3] sm:$0xff]  ;;  %v1591_v7 = vld [vmem:[#allocation5] sm:$0x3] }
 0x6de   :  { %1575 = vrot.lane.b32.xlu0 %v1571_v5, %s2216_s7  ;;  %2116 = vmatmul.mubr.msk.f32.vlgmr.msra.gmra.mxu0 %vm52_vm1, %v1591_v7 }
 0x6df   :  { %v1586_v8 = vld [vmem:[#allocation4] sm:$0x3]  ;;  %v1570_v22 = vld [vmem:[#allocation2 + $0x8] sm:$0xff] }
 0x6e0   :  { %2127 = vmatmul.mubr.msk.f32.vlgmr.msra.gmra.mxu1 %vm52_vm1, %v1586_v8 }
 0x6e2   :  { %1577 = vrot.lane.b32.xlu0 %v1572_v9, %s2216_s7 }
 0x750   :  { %v1576_v10 = vpop.permute.xlu0 %1575 }
 0x751   :  { %v1581_v20 = vsel %vm52_vm1, %v1569_v19, %v1576_v10 }
 0x752   :  { %1584 = vst.msk [vmem:[#allocation6] sm:$0xff] %vm1583_vm3, %v1581_v20 }
 0x754   :  { %v1578_v21 = vpop.permute.xlu0 %1577 }
 0x755   :  { %v1582_v23 = vsel %vm52_vm1, %v1570_v22, %v1578_v21 }
 0x756   :  { %1585 = vst.msk [vmem:[#allocation6 + $0x8] sm:$0xff] %vm1583_vm3, %v1582_v23 }
 0x757   :  { %2181 = shalt.err (!%p2178_p4)
}
 0x758   :  { %s2218_s27 = smov 128   ;;  %s2219_s28 = smov 8   ;;  %v1806_v27 = vld [vmem:[%s2636_s9] ss:$0 sm:$0xff] }
 0x759   :  { %1763 = dma.vmem_to_hbm [thread:$0]  %s1758_s25, 256, %s2637_s10, [#allocation7], %s2218_s27, %s2218_s27, %s2219_s28  }
 0x75a   :  { %s2220_s12 = smov [#allocation8]  }
 0x75b   :  { %s1770_s13 = sshll.u32 %s2220_s12, 4  ;;  %s1771_s13 = int_to_ptr.vmem [resolvable:$true] %s1770_s13 }
 0x75c   :  { %s2190_s3 = scalar_lea.vmem %s1771_s13, 32  ;;  %p2195_p6 = scmp.lt.s32.totalorder %s1771_s13, %s1771_s13 }
 0x75d   :  { %p2191_p5 = scmp.ne.s32.totalorder %s1771_s13, %s2190_s3  ;;  %p2196_p7 = scmp.lt.s32.totalorder %s2190_s3, %s2190_s3 }
 0x75f   :  { %p2197_p8 = por %p2196_p7, %p2195_p6 }
 0x761   :  { %p2198_p9 = pnand %p2197_p8, %p2191_p5 }
 0x79e   :  { %v1665_v24 = vpop.f32.mrf.mxu0 }
 0x7a0   :  { %v2117_v25 = vpop.f32.mrf.mxu0  ;;  %v1738_v26 = vpop.f32.mrf.mxu1 }
 0x7a1   :  { %v1739_v28 = vadd.f32 %v1738_v26, %v1665_v24 }
 0x7a2   :  { %v2128_v29 = vpop.f32.mrf.mxu1 }
 0x7a3   :  { %v1749_v30 = vadd.f32 %v1806_v27, %v1739_v28 }
 0x7a5   :  { %2168 = vtanh.f32 %v1749_v30 }
 0x7b2   :  { %v2169_v31 = vpop.eup %2168 }
 0x7b3   :  { %1751 = vst.msk [vmem:[#allocation8] sm:$0x3] %vm224_vm0, %v2169_v31 }
 0x7b4   :  { %2201 = shalt.err (!%p2198_p9)
}
 0x7b5   :  { %1773 = dma.vmem_to_hbm [thread:$0]  %s1771_s13, 32, %s2638_s11, [#allocation9]  }
 0x7b6   :  { %2210 = dma.done.wait [#allocation7], 256  }
 0x7b7   :  { %2211 = vsyncadd [#allocation7], 4294967040 }
 0x7b8   :  { %2212 = dma.done.wait [#allocation9], 32  }
 0x7b9   :  { %2213 = vsyncadd [#allocation9], 4294967264 }
 0x7ba   :  { %1780 = vsyncpa [#allocation7], 1 }
 0x7bb   :  { %1781 = vsyncpa [#allocation9], 1 }

</bundles_post_ra>
